<compile_context>
chip_gen: v7x
topology: tpu7x:2x2x1
jax: 0.10.0
libtpu: 0.0.40
codegen_flags: <defaults>
</compile_context>

<pallas_src>
import numpy as np
import jax
import jax.numpy as jnp
from jax.experimental import pallas as pl
from jax.experimental.pallas import tpu as pltpu


# -----------------------------------------------------------------------------
# Kernel (feature-major / lane-dense: batch lives on the 128-lane axis)
# -----------------------------------------------------------------------------
def robot_kernel(xt_ref, w1_ref, b1_ref, gt_ref, c_ref, ut_ref):
    xt = xt_ref[...]                                            # (D, TB) f32

    # ---- fcc1 + get_angles (transposed):  h1^T = W1 @ x^T + b1
    #      angles = 0.5*pi + pi*(sigmoid(h1) - 0.5) = pi * sigmoid(h1)
    h1 = jnp.dot(w1_ref[...], xt,
                 preferred_element_type=jnp.float32) + b1_ref[...]
    angles = jnp.pi * jax.nn.sigmoid(h1)                        # (D, TB)

    # ---- constrain, elementwise part (joint lengths folded into G on host):
    #      rods = 1 + (sigmoid(x) - 0.5)
    rods = 0.5 + jax.nn.sigmoid(xt)                             # (D, TB)

    # v^T = [rods*cos(angles) ; rods*sin(angles)]  (contraction axis = 2D)
    v = jnp.concatenate([rods * jnp.cos(angles),
                         rods * jnp.sin(angles)], axis=0)       # (2D, TB)

    # ---- folded tail (triu mask, coo, fcc2, graph matrices): ONE matmul
    u = jnp.dot(gt_ref[...], v,
                preferred_element_type=jnp.float32) + c_ref[...]
    ut_ref[...] = u.astype(ut_ref.dtype)


# -----------------------------------------------------------------------------
# Host-side algebraic fold of the post-fcc1 graph (exact up to reassociation)
# -----------------------------------------------------------------------------
def fold_params(params):
    w1, b1 = params["w1"], params["b1"]
    w2, b2 = params["w2"], params["b2"]
    joints, coo = params["joints"], params["coo"]
    m1, m2, m3, m4 = params["m1"], params["m2"], params["m3"], params["m4"]
    mlast = params["mlast"]
    D = w1.shape[0]
    H = D // 2

    # triu contraction rewritten as v @ maskT with maskT[j, i] = (j >= i)
    maskT = jnp.tril(jnp.ones((H, H), jnp.float32))             # (H, H)

    w2t = w2.T                                                  # (4H, S1)
    a1 = m1 + w2t[0 * H:1 * H] @ mlast                          # (H, M)
    a2 = m2 + w2t[1 * H:2 * H] @ mlast
    a3 = m3 + w2t[2 * H:3 * H] @ mlast
    a4 = m4 + w2t[3 * H:4 * H] @ mlast

    g1, g2, g3, g4 = maskT @ a1, maskT @ a2, maskT @ a3, maskT @ a4

    # vx = [vlx | vrx], vy = [vly | vry]  (left / right halves of the D rows)
    gx = jnp.concatenate([g1, g3], axis=0)                      # (D, M)
    gy = jnp.concatenate([g2, g4], axis=0)                      # (D, M)

    # Fold the per-feature joint lengths into the tail matrices (exact).
    # Flattening order [left | right] matches the x / rods lane order.
    jflat = joints.reshape(D)                                   # (D,)
    gx = jflat[:, None] * gx
    gy = jflat[:, None] * gy

    # Fuse the two tail matmuls: u = [vx | vy] @ G + const,  G = [gx ; gy]
    g = jnp.concatenate([gx, gy], axis=0)                       # (2D, M)

    const = (coo[0] @ a1 + coo[1] @ a2 + coo[2] @ a3 + coo[3] @ a4
             + b2 @ mlast)                                      # (M,)

    return {
        "w1": w1,                    # (D, D)   h1^T = W1 @ x^T
        "b1": b1[:, None],           # (D, 1)   column bias
        "gt": g.T,                   # (M, 2D)  u^T = G^T @ v^T
        "const": const[:, None],     # (M, 1)   column constant
    }


def _round_up(n, m):
    return ((n + m - 1) // m) * m


# -----------------------------------------------------------------------------
# Wrapper: batch-tiled pallas_call with resident weights, transposed layout
# -----------------------------------------------------------------------------
def robot_forward_pallas(x, params, *, tile_b=1024):
    folded = fold_params(params)
    B, D = x.shape
    M = folded["gt"].shape[0]

    # Lane-dense layout: batch is the fast 128-lane axis of every tile.
    b_pad = _round_up(B, 128)
    # Large tiles amortize the ~0.35 us per-grid-step cost, but leave >=2
    # parallel steps when the batch allows it so 2-TC parts (v7x megacore)
    # can shard the batch axis; on 1-TC chips the extra step is noise.
    tb = max(128, min(tile_b, _round_up(pl.cdiv(b_pad, 2), 128)))
    b_pad = _round_up(b_pad, tb)
    grid = (b_pad // tb,)

    # Wrapper-side transpose + zero-pad of the batch (padded columns are
    # harmless and sliced off below).
    xt = jnp.zeros((D, b_pad), jnp.float32).at[:, :B].set(x.T)

    def resident(shape):    # constant index_map => block stays resident in VMEM
        return pl.BlockSpec(shape, lambda i: (0, 0))

    out_t = pl.pallas_call(
        robot_kernel,
        out_shape=jax.ShapeDtypeStruct((M, b_pad), jnp.float32),
        grid=grid,
        in_specs=[
            pl.BlockSpec((D, tb), lambda i: (0, i)),   # x^T: streamed per tile
            resident((D, D)),                          # W1
            resident((D, 1)),                          # b1 (column)
            resident((M, 2 * D)),                      # G^T (folded tail)
            resident((M, 1)),                          # folded constant
        ],
        out_specs=pl.BlockSpec((M, tb), lambda i: (0, i)),  # u^T: lane-dense
        compiler_params=pltpu.CompilerParams(
            dimension_semantics=("parallel",)),
    )(xt, folded["w1"], folded["b1"], folded["gt"], folded["const"])

    return out_t[:, :B].T                              # back to (B, M)


# -----------------------------------------------------------------------------
# Pure-JAX reference (mirrors the PyTorch forward) for validation
# -----------------------------------------------------------------------------
def robot_forward_reference(x, p):
    D = x.shape[1]
    H = D // 2
    s1 = jax.nn.sigmoid(x @ p["w1"].T + p["b1"])
    angles = 0.5 * np.pi + 0.5 * np.pi * 2.0 * (s1 - 0.5)
    ratio = 1.0 + (jax.nn.sigmoid(x) - 0.5)
    rods_l = ratio[:, :H] * p["joints"][0]
    rods_r = ratio[:, H:] * p["joints"][1]
    tri_l = jnp.triu(jnp.tile(rods_l[:, None, :], (1, H, 1)))
    tri_r = jnp.triu(jnp.tile(rods_r[:, None, :], (1, H, 1)))
    cos_l = jnp.cos(angles[:, :H])[..., None]
    sin_l = jnp.sin(angles[:, :H])[..., None]
    cos_r = jnp.cos(angles[:, H:])[..., None]
    sin_r = jnp.sin(angles[:, H:])[..., None]
    lx = jnp.matmul(tri_l, cos_l)[..., 0] + p["coo"][0]
    ly = jnp.matmul(tri_l, sin_l)[..., 0] + p["coo"][1]
    rx = jnp.matmul(tri_r, cos_r)[..., 0] + p["coo"][2]
    ry = jnp.matmul(tri_r, sin_r)[..., 0] + p["coo"][3]
    bc_u = jnp.concatenate([lx, ly, rx, ry], axis=1)
    int_u = bc_u @ p["w2"].T + p["b2"]
    return (lx @ p["m1"] + ly @ p["m2"] + rx @ p["m3"] + ry @ p["m4"]
            + int_u @ p["mlast"])


def make_params(key, input_size, shapes, m_out):
    # Deterministic synthetic parameters (shapes follow RobotNetwork.__init__;
    # values are random instead of the all-zero init so the kernel is exercised).
    H = input_size // 2
    ks = jax.random.split(key, 10)
    f32 = jnp.float32
    return {
        "w1": 0.1 * jax.random.normal(ks[0], (input_size, input_size), f32),
        "b1": 0.1 * jax.random.normal(ks[1], (input_size,), f32),
        "w2": 0.1 * jax.random.normal(ks[2], (shapes[1], shapes[0]), f32),
        "b2": 0.1 * jax.random.normal(ks[3], (shapes[1],), f32),
        "joints": 1.0 + 0.1 * jax.random.normal(ks[4], (2, H), f32),
        "coo": 0.1 * jax.random.normal(ks[5], (4, H), f32),
        "m1": 0.1 * jax.random.normal(ks[6], (H, m_out), f32),
        "m2": 0.1 * jax.random.normal(ks[7], (H, m_out), f32),
        "m3": 0.1 * jax.random.normal(ks[8], (H, m_out), f32),
        "m4": 0.1 * jax.random.normal(ks[9], (H, m_out), f32),
        "mlast": 0.1 * jax.random.normal(jax.random.fold_in(key, 99),
                                         (shapes[1], m_out), f32),
    }


if __name__ == "__main__":
    B = 256                  # batched so the 1-D parallel grid has 2 steps
    INPUT_SIZE = 16          # => half_size H = 8
    SHAPES = (32, 24)        # shapes[0] must equal 2 * input_size (bc_u width)
    M_OUT = 20               # output dim of mat_list[1..4] and mat_list[-1]

    key = jax.random.PRNGKey(0)
    kx, kp = jax.random.split(key)
    x = jax.random.normal(kx, (B, INPUT_SIZE), jnp.float32)
    params = make_params(kp, INPUT_SIZE, SHAPES, M_OUT)

    u_kernel = jax.block_until_ready(robot_forward_pallas(x, params))
    u_ref = jax.block_until_ready(robot_forward_reference(x, params))

    # The host-side fold only reassociates sums, so results match tightly.
    np.testing.assert_allclose(np.asarray(u_kernel), np.asarray(u_ref),
                               rtol=1e-4, atol=1e-4)
    print("KERNEL_OK")
</pallas_src>

<mosaic_0001>
module attributes {stable_mosaic.version = 11 : i64} {
  func.func @robot_kernel(%arg0: i32, %arg1: memref<16x128xf32, #tpu.memory_space<vmem>>, %arg2: memref<16x16xf32, #tpu.memory_space<vmem>>, %arg3: memref<16x1xf32, #tpu.memory_space<vmem>>, %arg4: memref<20x32xf32, #tpu.memory_space<vmem>>, %arg5: memref<20x1xf32, #tpu.memory_space<vmem>>, %arg6: memref<20x128xf32, #tpu.memory_space<vmem>>) attributes {dimension_semantics = [#tpu.dimension_semantics<parallel>], iteration_bounds = array<i64: 2>, scalar_prefetch = 0 : i64, scratch_operands = 0 : i64, tpu.core_type = #tpu.core_type<tc>, window_params = [{transform_indices = @transform_0, window_bounds = array<i64: 16, 128>}, {pipeline_mode = #tpu.pipeline_mode<synchronous>, transform_indices = @transform_1, window_bounds = array<i64: 16, 16>}, {pipeline_mode = #tpu.pipeline_mode<synchronous>, transform_indices = @transform_2, window_bounds = array<i64: 16, 1>}, {pipeline_mode = #tpu.pipeline_mode<synchronous>, transform_indices = @transform_3, window_bounds = array<i64: 20, 32>}, {pipeline_mode = #tpu.pipeline_mode<synchronous>, transform_indices = @transform_4, window_bounds = array<i64: 20, 1>}, {transform_indices = @transform_5, window_bounds = array<i64: 20, 128>}]} {
    %c0 = arith.constant 0 : index
    %c0_0 = arith.constant 0 : index
    %0 = vector.load %arg1[%c0, %c0_0] : memref<16x128xf32, #tpu.memory_space<vmem>>, vector<16x128xf32>
    %c0_1 = arith.constant 0 : index
    %c0_2 = arith.constant 0 : index
    %1 = vector.load %arg2[%c0_1, %c0_2] : memref<16x16xf32, #tpu.memory_space<vmem>>, vector<16x16xf32>
    %cst = arith.constant dense<0.000000e+00> : vector<16x128xf32>
    %2 = tpu.matmul %1, %0, %cst {dimension_numbers = #tpu.dot_dimension_numbers<[1], [0], [0], [1], [0, 0, 1, 1], [], []>} : vector<16x16xf32>, vector<16x128xf32>, vector<16x128xf32> -> vector<16x128xf32>
    %c0_3 = arith.constant 0 : index
    %c0_4 = arith.constant 0 : index
    %3 = vector.load %arg3[%c0_3, %c0_4] : memref<16x1xf32, #tpu.memory_space<vmem>>, vector<16x1xf32>
    %4 = vector.broadcast %3 : vector<16x1xf32> to vector<16x128xf32>
    %5 = arith.addf %2, %4 : vector<16x128xf32>
    %6 = arith.negf %5 : vector<16x128xf32>
    %7 = math.exp %6 : vector<16x128xf32>
    %cst_5 = arith.constant 1.000000e+00 : f32
    %8 = vector.broadcast %cst_5 : f32 to vector<16x128xf32>
    %9 = arith.addf %8, %7 : vector<16x128xf32>
    %10 = arith.divf %8, %9 : vector<16x128xf32>
    %cst_6 = arith.constant 3.14159274 : f32
    %11 = vector.broadcast %cst_6 : f32 to vector<16x128xf32>
    %12 = arith.mulf %11, %10 : vector<16x128xf32>
    %13 = arith.negf %0 : vector<16x128xf32>
    %14 = math.exp %13 : vector<16x128xf32>
    %cst_7 = arith.constant 1.000000e+00 : f32
    %15 = vector.broadcast %cst_7 : f32 to vector<16x128xf32>
    %16 = arith.addf %15, %14 : vector<16x128xf32>
    %17 = arith.divf %15, %16 : vector<16x128xf32>
    %cst_8 = arith.constant 5.000000e-01 : f32
    %18 = vector.broadcast %cst_8 : f32 to vector<16x128xf32>
    %19 = arith.addf %18, %17 : vector<16x128xf32>
    %20 = math.cos %12 : vector<16x128xf32>
    %21 = arith.mulf %19, %20 : vector<16x128xf32>
    %22 = math.sin %12 : vector<16x128xf32>
    %23 = arith.mulf %19, %22 : vector<16x128xf32>
    %24 = tpu.concatenate %21, %23 in 0 : vector<16x128xf32>, vector<16x128xf32> -> vector<32x128xf32>
    %c0_9 = arith.constant 0 : index
    %c0_10 = arith.constant 0 : index
    %25 = vector.load %arg4[%c0_9, %c0_10] : memref<20x32xf32, #tpu.memory_space<vmem>>, vector<20x32xf32>
    %cst_11 = arith.constant dense<0.000000e+00> : vector<20x128xf32>
    %26 = tpu.matmul %25, %24, %cst_11 {dimension_numbers = #tpu.dot_dimension_numbers<[1], [0], [0], [1], [0, 0, 1, 1], [], []>} : vector<20x32xf32>, vector<32x128xf32>, vector<20x128xf32> -> vector<20x128xf32>
    %c0_12 = arith.constant 0 : index
    %c0_13 = arith.constant 0 : index
    %27 = vector.load %arg5[%c0_12, %c0_13] : memref<20x1xf32, #tpu.memory_space<vmem>>, vector<20x1xf32>
    %28 = vector.broadcast %27 : vector<20x1xf32> to vector<20x128xf32>
    %29 = arith.addf %26, %28 : vector<20x128xf32>
    %c0_14 = arith.constant 0 : index
    %c0_15 = arith.constant 0 : index
    %30 = vector.load %arg6[%c0_14, %c0_15] : memref<20x128xf32, #tpu.memory_space<vmem>>, vector<20x128xf32>
    tpu.vector_store %arg6[%c0_14, %c0_15], %29 {strides = array<i32>} : memref<20x128xf32, #tpu.memory_space<vmem>>, vector<20x128xf32>,
    return
  }
  func.func @transform_0(%arg0: i32) -> (i32, i32) {
    %c0_i32 = arith.constant 0 : i32
    %c0_i32_0 = arith.constant 0 : i32
    return %c0_i32, %arg0 : i32, i32
  }
  func.func @transform_1(%arg0: i32) -> (i32, i32) {
    %c0_i32 = arith.constant 0 : i32
    %c0_i32_0 = arith.constant 0 : i32
    %c0_i32_1 = arith.constant 0 : i32
    return %c0_i32, %c0_i32_0 : i32, i32
  }
  func.func @transform_2(%arg0: i32) -> (i32, i32) {
    %c0_i32 = arith.constant 0 : i32
    %c0_i32_0 = arith.constant 0 : i32
    %c0_i32_1 = arith.constant 0 : i32
    return %c0_i32, %c0_i32_0 : i32, i32
  }
  func.func @transform_3(%arg0: i32) -> (i32, i32) {
    %c0_i32 = arith.constant 0 : i32
    %c0_i32_0 = arith.constant 0 : i32
    %c0_i32_1 = arith.constant 0 : i32
    return %c0_i32, %c0_i32_0 : i32, i32
  }
  func.func @transform_4(%arg0: i32) -> (i32, i32) {
    %c0_i32 = arith.constant 0 : i32
    %c0_i32_0 = arith.constant 0 : i32
    %c0_i32_1 = arith.constant 0 : i32
    return %c0_i32, %c0_i32_0 : i32, i32
  }
  func.func @transform_5(%arg0: i32) -> (i32, i32) {
    %c0_i32 = arith.constant 0 : i32
    %c0_i32_0 = arith.constant 0 : i32
    return %c0_i32, %arg0 : i32, i32
  }
}

</mosaic_0001>

<bundles_post_ra>
// kernel: tpu_custom_call.1
= control target key start
LH: loop header
LB: loop body
LE: loop exit
PB: predicated region body
PF: predicated region fallthrough
CT: control target
= control target key end

     0   :  { %10 = vsyncpa [#allocation4], 0  ;;  %s1714_s0 = inlined_call_operand.vmem [shape: f32[16,256], index: 0, kind: input, shape index: {}]   ;;  %s1715_s1 = inlined_call_operand.hbm [shape: f32[16,16], index: 1, kind: input, shape index: {}]   ;;  %s1716_s2 = inlined_call_operand.vmem [shape: f32[16,1], index: 2, kind: input, shape index: {}]   ;;  %s1717_s3 = inlined_call_operand.hbm [shape: f32[20,32], index: 3, kind: input, shape index: {}]   ;;  %s1718_s4 = inlined_call_operand.vmem [shape: f32[20,1], index: 4, kind: input, shape index: {}]   ;;  %s1719_s5 = inlined_call_operand.hbm [shape: f32[20,256], index: 5, kind: output, shape index: {}]  }
   0x1   :  { %11 = vsyncpa [#allocation7], 0 }
   0x2   :  { %12 = vsyncpa [#allocation5], 0 }
   0x3   :  { %14 = vsyncpa [#allocation5 + $0x1], 0  ;;  %s1426_s18 = smov 0   ;;  %s1428_s19 = smov 0  }
   0x4   :  { %s1430_s20 = smov 0   ;;  %s1432_s21 = smov 0  }
   0x5 LB: > { %s1447_s22 = sadd.s32 4294967295, %s1376_s21   ;;  %s1052_s23 = sadd.s32 4294967294, %s1376_s21   ;;  %s1376_s21 = sphi %s1432_s21, %s1739_s21   ;;  %s1372_s20 = sphi %s1430_s20, %s1738_s20   ;;  %s1368_s19 = sphi %s1428_s19, %s1737_s19   ;;  %s1364_s18 = sphi %s1426_s18, %s1736_s18  }
   0x6   : > { %s1451_s24 = sadd.s32 1, %s1376_s21   ;;  %s27_s25 = sadd.s32 1, %s1372_s20 }
   0x7   : > { %s24_s26 = ssub.s32 %s1376_s21, %s1451_s24  ;;  %p34_p0 = scmp.ne.s32.totalorder %s1372_s20, %s1368_s19 }
   0x8   : > { %p25_p1 = scmp.eq.s32.totalorder %s24_s26, 0  ;;  %p35_p2 = scmp.eq.s32.totalorder %s1376_s21, 0 }
   0x9   : > { %p148_p3 = scmp.eq.s32.totalorder %s1447_s22, 1  ;;  %p153_p4 = scmp.ne.s32.totalorder %s1368_s19, %s1364_s18 }
   0xa   : > { %s1463_s27 = scalar_select %p25_p1, %s1372_s20, %s27_s25  }
   0xb   : > { %p1465_p5 = por %p35_p2, %p34_p0  ;;  %p1469_p6 = por %p148_p3, %p34_p0 }
   0xc   : > { %p154_p7 = scmp.eq.s32.totalorder %s1052_s23, 1  ;;  %p1053_p8 = scmp.ge.s32.totalorder %s1376_s21, 1 }
   0xd   : > { %s1723_s28 = scalar_select %p1465_p5, 1, 0 }
   0xe   : > { %s1724_s29 = scalar_select %p1469_p6, 1, 0 }
   0xf   : > { %p161_p9 = scmp.lt.s32.totalorder %s1376_s21, 3  ;;  %p1475_p10 = por %p154_p7, %p153_p4 }
  0x10   : > { %p1720_p11 = scmp.eq.s32.totalorder %s1447_s22, 0  ;;  %s1378_s7 = smov [#allocation3]  }
  0x11   : > { %s1725_s30 = scalar_select %p1475_p10, 1, 0 }
  0x12   : > { %p1480_p12 = pnand %p1053_p8, %p161_p9  ;;  %s173_s8 = sshll.u32 %s1378_s7, 4  ;;  %s174_s8 = int_to_ptr.vmem [resolvable:$true] %s173_s8 }
  0x13   : > { %s1379_s10 = smov [#allocation6]   ;;  %s1250_s14 = scalar_lea.hbm %s1715_s1, 256 }
  0x14   : > { %s1726_s6 = scalar_select %p1480_p12, 1, 0 }
  0x15   : > { %p1159_p13 = pneg %p1480_p12  ;;  %s189_s11 = sshll.u32 %s1379_s10, 4  ;;  %s1492_s11 = int_to_ptr.vmem [resolvable:$true] %s189_s11 }
  0x16   : > { %p1251_p1 = scmp.ne.s32.totalorder %s1715_s1, %s1250_s14  ;;  %p1257_p7 = scmp.lt.u32.totalorder %s1250_s14, %s1715_s1 }
  0x17   : > { %p1488_p0 = pnand %p1720_p11, %p1159_p13 }
  0x19   : > { %p1252_p2 = pneg %p1488_p0 }
  0x1b   : > { %p1253_p3 = pnand %p1252_p2, %p1251_p1 }
  0x1d   : > { %p1254_p4 = pneg %p1253_p3 }
  0x1f   : > { %p1259_p8 = pnand %p1257_p7, %p1254_p4 }
  0x21   : > { %1262 = shalt.err (!%p1259_p8)
}
  0x22   : > { %s1263_s25 = scalar_lea.vmem %s174_s8, 256  ;;  %p1271_p10 = scmp.lt.s32.totalorder %s174_s8, %s174_s8 }
  0x23   : > { %p1264_p9 = scmp.ne.s32.totalorder %s174_s8, %s1263_s25  ;;  %p1272_p6 = scmp.lt.s32.totalorder %s1263_s25, %s1263_s25 }
  0x25   : > { %p1266_p13 = pnand %p1264_p9, %p1252_p2  ;;  %p1273_p12 = por %p1272_p6, %p1271_p10 }
  0x27   : > { %p1267_p11 = pneg %p1266_p13 }
  0x29   : > { %p1274_p5 = pnand %p1273_p12, %p1267_p11 }
  0x2b   : > { %1277 = shalt.err (!%p1274_p5)
}
  0x2c   : > { %s1380_s26 = smov 128   ;;  %s1381_s7 = smov 8  }
  0x2d   : > { %1162 = dma.hbm_to_vmem [thread:$0]  (!%p1488_p0), %s1715_s1, 256, %s174_s8, [#allocation4], %s1380_s26, %s1380_s26, %s1381_s7  }
  0x2e   : > { %s1278_s15 = scalar_lea.hbm %s1717_s3, 384 }
  0x2f   : > { %p1279_p1 = scmp.ne.s32.totalorder %s1717_s3, %s1278_s15  ;;  %p1285_p10 = scmp.lt.u32.totalorder %s1278_s15, %s1717_s3 }
  0x31   : > { %p1281_p5 = pnand %p1279_p1, %p1252_p2 }
  0x33   : > { %p1282_p6 = pneg %p1281_p5 }
  0x35   : > { %p1287_p11 = pnand %p1285_p10, %p1282_p6 }
  0x37   : > { %1290 = shalt.err (!%p1287_p11)
}
  0x38   : > { %s1291_s8 = scalar_lea.vmem %s1492_s11, 384  ;;  %p1299_p7 = scmp.lt.s32.totalorder %s1492_s11, %s1492_s11 }
  0x39   : > { %p1292_p12 = scmp.ne.s32.totalorder %s1492_s11, %s1291_s8  ;;  %p1300_p8 = scmp.lt.s32.totalorder %s1291_s8, %s1291_s8 }
  0x3b   : > { %p1294_p3 = pnand %p1292_p12, %p1252_p2  ;;  %p1301_p9 = por %p1300_p8, %p1299_p7 }
  0x3d   : > { %p1295_p4 = pneg %p1294_p3 }
  0x3f   : > { %p1302_p13 = pnand %p1301_p9, %p1295_p4 }
  0x41   : > { %1305 = shalt.err (!%p1302_p13)
}
  0x42   : > { %1165 = dma.hbm_to_vmem [thread:$0]  (!%p1488_p0), %s1717_s3, 384, %s1492_s11, [#allocation7], %s1380_s26, %s1380_s26, %s1381_s7  }
  0x43   : > { %p1056_p1 = scmp.ge.s32.totalorder %s1376_s21, 2 }
  0x44   : > { %p1728_p2 = scmp.ne.s32.totalorder (!%p1056_p1), %s1723_s28, 0 }
  0x45   : > { %202 = sbr.rel (%p1056_p1) target bundleno = 83 (0x53), region = 32 }
  0x4c   : > { %205 = sbr.rel (!%p1728_p2) target bundleno = 83 (0x53), region = 36  ;;  %s207_s13 = sand.u32 (%p1728_p2), 1, %s1372_s20  }
  0x4d   : > { %s1058_s14 = sshll.u32 (%p1728_p2), %s1376_s21, 3  ;;  %s1057_s15 = sshll.u32 (%p1728_p2), %s207_s13, 4 }
  0x4e   : > { %s211_s17 = scalar_lea.vmem (%p1728_p2), %s1714_s0, %s1058_s14  ;;  %s209_s11 = scalar_lea.vmem (%p1728_p2), [#allocation2], %s1057_s15 }
  0x4f   : > { %v241_v0 = vld [vmem:[%s211_s17] sm:$0xff] (%p1728_p2)  ;;  %v243_v1 = vld [vmem:[%s211_s17 + $0x10] sm:$0xff] (%p1728_p2) }
  0x50   : > { %242 = vst [vmem:[%s209_s11] sm:$0xff] (%p1728_p2), %v241_v0  ;;  %244 = vst [vmem:[%s209_s11 + $0x8] sm:$0xff] (%p1728_p2), %v243_v1 }
  0x53 PF: > { %p1729_p0 = scmp.ne.s32.totalorder %s1726_s6, 0 }
  0x54   : > { %s1554_s28 = sand.u32 (!%p1729_p0), 1, %s1368_s19   ;;  %p1730_p5 = scmp.eq.s32.totalorder (!%p1729_p0), %s1447_s22, 0 }
  0x55   : > { %253 = sbr.rel (%p1729_p0) target bundleno = 679 (0x2a7), region = 74  ;;  %s1060_s26 = sshll.u32 (!%p1729_p0), %s1554_s28, 4 }
  0x56   : > { %s258_s7 = scalar_lea.vmem (!%p1729_p0), [#allocation2], %s1060_s26 }
  0x5c   : > { %1351 = dma.done.wait (%p1730_p5), [#allocation4], 256   ;;  %p1731_p6 = pmov %p1730_p5 }
  0x5d   : > { %p1732_p10 = pmov %p1730_p5 }
  0x5e   : > { %1353 = vsyncadd (%p1731_p6), [#allocation4], 4294967040 }
  0x5f   : > { %1355 = dma.done.wait (%p1732_p10), [#allocation7], 384   ;;  %p1733_p11 = pmov %p1730_p5 }
  0x60   : > { %v1382_v2 = vmov 0   ;;  %vm307_vm0 = vcmask 130048   ;;  %v1565_v3 = vld [vmem:[%s258_s7] sm:$0xff]  ;;  %v1567_v4 = vld [vmem:[%s258_s7 + $0x8] sm:$0xff]  ;;  %v1383_v11 = vmov 0.0|0.0   ;;  %vm1384_vm1 = vmmov 0  }
  0x61   : > { %1357 = vsyncadd (%p1733_p11), [#allocation7], 4294966912  ;;  %1224 = vset.pattern.permute.xlu0 %v1382_v2  ;;  %1225 = vset.pattern.permute.xlu1 %v1382_v2  ;;  %v293_v5 = vld [vmem:[#allocation3] sm:$0xff]  ;;  %v1126_v6 = vpack.c.bf16 %v1567_v4, %v1565_v3  ;;  %v296_v8 = vld [vmem:[%s1716_s2 + $0x8] sm:$0xff]  ;;  %v1385_v19 = vmov 0.0   ;;  %s1140_s9 = smul.u32 24, %s1554_s28 }
  0x62   : > { %1106 = vmatprep.mubr.msk.f32.mxu0 %vm307_vm0, %v293_v5  ;;  %v295_v7 = vld [vmem:[%s1716_s2] sm:$0xff]  ;;  %v294_v9 = vld [vmem:[#allocation3 + $0x8] sm:$0xff]  ;;  %v840_v10 = vld [vmem:[%s1718_s4 + $0x10] sm:$0xf]  ;;  %1136 = vmatprep.subr.bf16.mxu1 %v1383_v11  ;;  %v1386_v51 = vmov 683565275  }
  0x63   : > { %299 = vperm.xlu0 %1224, %v295_v7   ;;  %1127 = vmatprep.subr.bf16.mxu0 %v1126_v6  ;;  %v838_v21 = vld [vmem:[%s1718_s4] sm:$0xff]  ;;  %v839_v22 = vld [vmem:[%s1718_s4 + $0x8] sm:$0xff]  ;;  %v1387_v55 = vmov 2475754826   ;;  %v1388_v57 = vmov 2131351028  }
  0x64   : > { %1129 = vmatpush3.bf16.msra.mxu0 %v1126_v6  ;;  %1120 = vmatprep.mubr.msk.f32.mxu1 %vm1384_vm1, %v1385_v19  ;;  %v1389_v59 = vmov 2102212464   ;;  %v1390_v61 = vmov 920167782   ;;  %v1391_v6 = vmov 1326507024  }
  0x65   : > { %1130 = vmatprep.subr.bf16.mxu0 %v1383_v11  ;;  %843 = vperm.xlu1 %1225, %v838_v21   ;;  %s290_s17 = scalar_lea.vmem [#allocation8], %s1140_s9  ;;  %s1088_s26 = sshll.u32 %s1447_s22, 7 }
  0x66   : > { %s962_s11 = sshll.u32 %s290_s17, 4  ;;  %s1670_s23 = scalar_lea.hbm %s1719_s5, %s1088_s26  ;;  %s1665_s11 = int_to_ptr.vmem [resolvable:$true] %s962_s11 }
  0x67   : > { %304 = vperm.xlu0 %1224, %v296_v8   ;;  %1107 = vmatmul.mubr.msk.f32.vlgmr.msra.gmra.mrb[0].mxu0 %vm307_vm0, %v294_v9  ;;  %s950_s25 = scalar_lea.sflag [#allocation5], %s1554_s28  ;;  %s1306_s8 = scalar_lea.vmem %s1665_s11, 384 }
  0x68   : > { %1117 = vmatprep.mubr.msk.f32.mxu0 %vm1384_vm1, %v1385_v19  ;;  %p1307_p12 = scmp.ne.s32.totalorder %s1665_s11, %s1306_s8  ;;  %p1734_p3 = scmp.ne.s32.totalorder %s1724_s29, 0 }
  0x69   : > { %848 = vperm.xlu1 %1225, %v839_v22   ;;  %s1392_s22 = smov [#allocation8]  }
  0x6a   : > { %p1308_p4 = pnand %p1307_p12, %p1734_p3  ;;  %s1310_s10 = sshll.u32 %s1392_s22, 4  ;;  %s1311_s10 = int_to_ptr.vmem [resolvable:$false] %s1310_s10 }
  0x6b   : > { %853 = vperm.xlu0 %1224, %v840_v10   ;;  %s1312_s12 = scalar_lea.vmem %s1311_s10, 768  ;;  %p1313_p8 = scmp.lt.s32.totalorder %s1665_s11, %s1311_s10 }
  0x6c   : > { %p1309_p7 = pneg %p1308_p4  ;;  %p1314_p9 = scmp.lt.s32.totalorder %s1312_s12, %s1306_s8 }
  0x6e   : > { %p1315_p13 = por %p1314_p9, %p1313_p8 }
  0x70   : > { %p1316_p2 = pnand %p1315_p13, %p1309_p7 }
  0xe2   : > { %v300_v12 = vpop.permute.xlu0 %299 }
  0xe6   : > { %v305_v13 = vpop.permute.xlu0 %304 }
 0x13a   : > { %v1108_v14 = vpop.f32.mrb[0].mxu0 }
 0x13b   : > { %v386_v15 = vadd.f32 %v1108_v14, %v305_v13  ;;  %v380_v16 = vpop.f32.mrb[1].mxu0 }
 0x13c   : > { %v381_v17 = vadd.f32 %v380_v16, %v300_v12 }
 0x13d   : > { %v1066_v18 = vmul.f32 -1.442695, %v386_v15 }
 0x13e   : > { %v1065_v20 = vmul.f32 -1.442695, %v381_v17 }
 0x13f   : > { %1226 = vpow2.f32 %v1066_v18 }
 0x140   : > { %1228 = vpow2.f32 %v1065_v20 }
 0x149   : > { %v1227_v23 = vpop.eup %1226 }
 0x14a   : > { %v1229_v24 = vpop.eup %1228  ;;  %v396_v25 = vadd.f32 1.0, %v1227_v23 }
 0x14b   : > { %v395_v26 = vadd.f32 1.0, %v1229_v24 }
 0x14c   : > { %1230 = vrcp.f32 %v396_v25 }
 0x14d   : > { %1232 = vrcp.f32 %v395_v26 }
 0x156   : > { %v1231_v27 = vpop.eup %1230 }
 0x157   : > { %v1233_v28 = vpop.eup %1232  ;;  %v1592_v29 = vmul.f32 3.1415927, %v1231_v27 }
 0x158   : > { %v1594_v30 = vmul.f32 3.1415927, %v1233_v28 }
 0x159   : > { %v520_v31 = vand.u32 2147483647, %v1592_v29  ;;  %v523_v32 = vand.u32 2139095040, %v1592_v29  ;;  %vm522_vm0 = vcmp.lt.s32.totalorder %v1592_v29, 0 }
 0x15a   : > { %v420_v33 = vand.u32 2139095040, %v1594_v30  ;;  %v417_v36 = vand.u32 2147483647, %v1594_v30 }
 0x15b   : > { %v524_v34 = vshrl.u32 %v523_v32, 23  ;;  %v527_v35 = vand.u32 8388607, %v520_v31 }
 0x15c   : > { %v421_v37 = vshrl.u32 %v420_v33, 23  ;;  %v1604_v42 = vand.u32 8388607, %v417_v36 }
 0x15d   : > { %v1073_v38 = vadd.s32 4294967169, %v524_v34  ;;  %v528_v41 = vor.u32 8388608, %v527_v35 }
 0x15e   : > { %v1069_v39 = vadd.s32 4294967169, %v421_v37  ;;  %v425_v49 = vor.u32 8388608, %v1604_v42 }
 0x15f   : > { %v530_v40 = vadd.s32 1, %v1073_v38  ;;  %v1606_v48 = vshll.u32 %v528_v41, 8 }
 0x160   : > { %v427_v43 = vadd.s32 1, %v1069_v39 }
 0x161   : > { %vm531_vm2 = vcmp.gt.s32.totalorder %v530_v40, 0 }
 0x162   : > { %v532_v44 = vsel %vm531_vm2, %v530_v40, 0  ;;  %vm428_vm3 = vcmp.gt.s32.totalorder %v427_v43, 0  ;;  %vm521_vm2 = vcmp.le.f32.partialorder %v520_v31, 0.7853982 }
 0x163   : > { %v533_v45 = vshrl.u32 %v532_v44, 5  ;;  %v534_v46 = vand.u32 31, %v532_v44  ;;  %v429_v47 = vsel %vm428_vm3, %v427_v43, 0  ;;  %vm419_vm3 = vcmp.lt.s32.totalorder %v1594_v30, 0 }
 0x164   : > { %v1609_v53 = vshrl.u32 %v429_v47, 5  ;;  %v431_v54 = vand.u32 31, %v429_v47 }
 0x165   : > { %v535_v50 = vsub.s32 32, %v534_v46  ;;  %v537_v52 = vshll.u32 %v1386_v51, %v534_v46  ;;  %v540_v56 = vshll.u32 %v1387_v55, %v534_v46  ;;  %v543_v58 = vshll.u32 %v1388_v57, %v534_v46 }
 0x166   : > { %v546_v60 = vshll.u32 %v1389_v59, %v534_v46  ;;  %v549_v62 = vshll.u32 %v1390_v61, %v534_v46  ;;  %vm552_vm4 = vcmp.lt.s32.totalorder %v533_v45, 1  ;;  %vm553_vm5 = vcmp.lt.s32.totalorder %v533_v45, 2 }
 0x167   : > { %v538_v63 = vshrl.u32 %v1387_v55, %v535_v50  ;;  %v541_v0 = vshrl.u32 %v1388_v57, %v535_v50  ;;  %v544_v1 = vshrl.u32 %v1389_v59, %v535_v50  ;;  %v536_v2 = vshrl.u32 %v1386_v51, %v535_v50 }
 0x168   : > { %v547_v5 = vshrl.u32 %v1390_v61, %v535_v50  ;;  %v550_v7 = vshrl.u32 %v1391_v6, %v535_v50  ;;  %v432_v12 = vsub.s32 32, %v431_v54  ;;  %vm554_vm6 = vcmp.lt.s32.totalorder %v533_v45, 3 }
 0x169   : > { %v539_v8 = vor.u32 %v538_v63, %v537_v52  ;;  %v542_v9 = vor.u32 %v541_v0, %v540_v56  ;;  %v545_v10 = vor.u32 %v544_v1, %v543_v58  ;;  %vm555_vm7 = vcmp.lt.s32.totalorder %v533_v45, 4 }
 0x16a   : > { %v548_v13 = vor.u32 %v547_v5, %v546_v60  ;;  %v551_v14 = vor.u32 %v550_v7, %v549_v62  ;;  %v434_v23 = vshll.u32 %v1386_v51, %v431_v54  ;;  %v435_v26 = vshrl.u32 %v1387_v55, %v432_v12 }
 0x16b   : > { %v556_v15 = vsel %vm552_vm4, %v536_v2, %v539_v8  ;;  %v557_v16 = vsel %vm555_vm7, %v545_v10, 2102212464  ;;  %v560_v17 = vsel %vm552_vm4, %v539_v8, %v542_v9  ;;  %v564_v18 = vsel %vm552_vm4, %v542_v9, %v545_v10 }
 0x16c   : > { %v558_v20 = vsel %vm554_vm6, %v542_v9, %v557_v16  ;;  %v561_v21 = vsel %vm555_vm7, %v548_v13, 920167782  ;;  %v565_v22 = vsel %vm555_vm7, %v551_v14, 1326507024  ;;  %v437_v27 = vshll.u32 %v1387_v55, %v431_v54 }
 0x16d   : > { %v562_v24 = vsel %vm554_vm6, %v545_v10, %v561_v21  ;;  %v566_v25 = vsel %vm554_vm6, %v548_v13, %v565_v22  ;;  %v559_v28 = vsel %vm553_vm5, %v556_v15, %v558_v20  ;;  %v438_v34 = vshrl.u32 %v1388_v57, %v432_v12 }
 0x16e   : > { %v563_v32 = vsel %vm553_vm5, %v560_v17, %v562_v24  ;;  %v567_v33 = vsel %vm553_vm5, %v564_v18, %v566_v25  ;;  %v436_v40 = vor.u32 %v435_v26, %v434_v23  ;;  %v440_v42 = vshll.u32 %v1388_v57, %v431_v54 }
 0x16f   : > { %v1618_v35 = vmul.u32.u64.low %v1606_v48, %v567_v33  ;;  %v1619_v37 = vmul.u32.u64.high %v1606_v48, %v567_v33, %v1618_v35  ;;  %v1622_v38 = vmul.u32.u64.low %v1606_v48, %v563_v32  ;;  %v1623_v39 = vmul.u32.u64.high %v1606_v48, %v563_v32, %v1622_v38 }
 0x170   : > { %v439_v41 = vor.u32 %v438_v34, %v437_v27  ;;  %v441_v43 = vshrl.u32 %v1389_v59, %v432_v12  ;;  %v443_v44 = vshll.u32 %v1389_v59, %v431_v54  ;;  %v444_v46 = vshrl.u32 %v1390_v61, %v432_v12 }
 0x171   : > { %v447_v47 = vshrl.u32 %v1391_v6, %v432_v12  ;;  %v465_v50 = vshll.u32 %v425_v49, 8  ;;  %v575_v45 = vmul.u32 %v1606_v48, %v559_v28  ;;  %v433_v52 = vshrl.u32 %v1386_v51, %v432_v12 }
 0x172   : > { %v442_v55 = vor.u32 %v441_v43, %v440_v42  ;;  %v446_v56 = vshll.u32 %v1390_v61, %v431_v54  ;;  %vm577_vm8 = vc.u32 %v1619_v37, %v1622_v38  ;;  %v578_v58 = vadd.s32 1, %v1623_v39 }
 0x173   : > { %v445_v60 = vor.u32 %v444_v46, %v443_v44  ;;  %vm449_vm9 = vcmp.lt.s32.totalorder %v1609_v53, 1  ;;  %vm451_vm10 = vcmp.lt.s32.totalorder %v1609_v53, 3  ;;  %vm452_vm11 = vcmp.lt.s32.totalorder %v1609_v53, 4 }
 0x174   : > { %v448_v62 = vor.u32 %v447_v47, %v446_v56  ;;  %v457_v57 = vsel %vm449_vm9, %v436_v40, %v439_v41  ;;  %v579_v49 = vsel %vm577_vm8, %v578_v58, %v1623_v39  ;;  %v454_v48 = vsel %vm452_vm11, %v442_v55, 2102212464 }
 0x175   : > { %v458_v51 = vsel %vm452_vm11, %v445_v60, 920167782  ;;  %v461_v59 = vsel %vm449_vm9, %v439_v41, %v442_v55  ;;  %v580_v54 = vadd.s32 %v579_v49, %v575_v45  ;;  %vm450_vm12 = vcmp.lt.s32.totalorder %v1609_v53, 2 }
 0x176   : > { %v459_v61 = vsel %vm451_vm10, %v442_v55, %v458_v51  ;;  %v462_v63 = vsel %vm452_vm11, %v448_v62, 1326507024  ;;  %v453_v0 = vsel %vm449_vm9, %v433_v52, %v436_v40  ;;  %v455_v1 = vsel %vm451_vm10, %v439_v41, %v454_v48 }
 0x177   : > { %v460_v2 = vsel %vm450_vm12, %v457_v57, %v459_v61  ;;  %v463_v5 = vsel %vm451_vm10, %v445_v60, %v462_v63  ;;  %v581_v6 = vadd.s32 536870912, %v580_v54  ;;  %v456_v14 = vsel %vm450_vm12, %v453_v0, %v455_v1 }
 0x178   : > { %v464_v7 = vsel %vm450_vm12, %v461_v59, %v463_v5  ;;  %v1635_v8 = vmul.u32.u64.low %v465_v50, %v460_v2  ;;  %v1636_v9 = vmul.u32.u64.high %v465_v50, %v460_v2, %v1635_v8  ;;  %v472_v53 = vmul.u32 %v465_v50, %v456_v14 }
 0x179   : > { %v1638_v10 = vmul.u32.u64.low %v465_v50, %v464_v7  ;;  %v1639_v12 = vmul.u32.u64.high %v465_v50, %v464_v7, %v1638_v10  ;;  %v582_v13 = vshrl.u32 %v581_v6, 30  ;;  %v1068_v24 = vmul.f32 -1.442695, %v1567_v4 }
 0x17a   : > { %v475_v16 = vadd.s32 1, %v1636_v9  ;;  %v576_v35 = vadd.s32 %v1622_v38, %v1619_v37  ;;  %v1067_v4 = vmul.f32 -1.442695, %v1565_v3  ;;  %vm418_vm4 = vcmp.le.f32.partialorder %v417_v36, 0.7853982 }
 0x17b   : > { %v583_v15 = vshll.u32 %v582_v13, 30  ;;  %vm474_vm13 = vc.u32 %v1639_v12, %v1635_v8  ;;  %1234 = vpow2.f32 %v1068_v24  ;;  %v473_v37 = vadd.s32 %v1635_v8, %v1639_v12 }
 0x17c   : > { %v476_v18 = vsel %vm474_vm13, %v475_v16, %v1636_v9  ;;  %1236 = vpow2.f32 %v1067_v4  ;;  %v606_v48 = vsub.s32 4, %v582_v13  ;;  %vm612_vm11 = vweird.f32 %v1592_v29 }
 0x17d   : > { %v584_v17 = vsub.s32 %v580_v54, %v583_v15  ;;  %v477_v20 = vadd.s32 %v476_v18, %v472_v53 }
 0x17e   : > { %v607_v1 = vsel %vm522_vm0, %v606_v48, %v582_v13 }
 0x17f   : > { %v586_v21 = vsub.s32 0, %v584_v17  ;;  %v478_v22 = vadd.s32 536870912, %v477_v20  ;;  %v609_v9 = vsel %vm521_vm2, 0, %v607_v1 }
 0x180   : > { %v822_v15 = vadd.s32 3, %v609_v9  ;;  %v613_v18 = vand.u32 3, %v609_v9 }
 0x181   : > { %v1074_v23 = vmin.u32 %v586_v21, %v584_v17  ;;  %v479_v25 = vshrl.u32 %v478_v22, 30 }
 0x182   : > { %vm615_vm5 = vcmp.eq.s32.totalorder %v613_v18, 0  ;;  %vm618_vm6 = vcmp.eq.s32.totalorder %v613_v18, 2  ;;  %vm614_vm9 = vcmp.lt.s32.totalorder %v613_v18, 2 }
 0x183   : > { %v588_v26 = vclz %v1074_v23  ;;  %v480_v27 = vshll.u32 %v479_v25, 30  ;;  %v503_v12 = vsub.s32 4, %v479_v25 }
 0x185   : > { %v1075_v28 = vadd.s32 4294967294, %v588_v26  ;;  %v481_v32 = vsub.s32 %v477_v20, %v480_v27  ;;  %v1235_v55 = vpop.eup %1234  ;;  %v504_v13 = vsel %vm419_vm3, %v503_v12, %v479_v25  ;;  %v823_v20 = vand.u32 3, %v822_v15 }
 0x186   : > { %v410_v57 = vadd.f32 1.0, %v1235_v55  ;;  %v1237_v6 = vpop.eup %1236  ;;  %v506_v22 = vsel %vm418_vm4, 0, %v504_v13 }
 0x187   : > { %vm1076_vm14 = vcmp.lt.s32.totalorder %v1075_v28, 0  ;;  %v483_v34 = vsub.s32 0, %v481_v32  ;;  %v409_v14 = vadd.f32 1.0, %v1237_v6  ;;  %vm828_vm7 = vcmp.eq.s32.totalorder %v823_v20, 2 }
 0x188   : > { %v591_v33 = vsel %vm1076_vm14, 0, %v1075_v28  ;;  %1238 = vrcp.f32 %v410_v57  ;;  %v718_v28 = vadd.s32 3, %v506_v22  ;;  %vm825_vm8 = vcmp.eq.s32.totalorder %v823_v20, 0 }
 0x189   : > { %v592_v39 = vsub.s32 32, %v591_v33  ;;  %v596_v40 = vsub.s32 4294967266, %v591_v33  ;;  %v1070_v41 = vmin.u32 %v483_v34, %v481_v32  ;;  %v593_v42 = vshll.u32 %v584_v17, %v591_v33 }
 0x18a   : > { %vm824_vm10 = vcmp.lt.s32.totalorder %v823_v20, 2 }
 0x18b   : > { %v594_v43 = vshrl.u32 %v576_v35, %v592_v39  ;;  %v597_v44 = vadd.s32 127, %v596_v40  ;;  %v485_v46 = vclz %v1070_v41  ;;  %v510_v41 = vand.u32 3, %v506_v22 }
 0x18d   : > { %v595_v47 = vor.u32 %v594_v43, %v593_v42  ;;  %v598_v50 = vshll.u32 %v597_v44, 23  ;;  %v1071_v45 = vadd.s32 4294967294, %v485_v46  ;;  %v719_v43 = vand.u32 3, %v718_v28 }
 0x18e   : > { %vm515_vm12 = vcmp.eq.s32.totalorder %v510_v41, 2  ;;  %vm512_vm14 = vcmp.eq.s32.totalorder %v510_v41, 0 }
 0x18f   : > { %v599_v52 = vor.u32 4788187, %v598_v50  ;;  %vm1072_vm15 = vcmp.lt.s32.totalorder %v1071_v45, 0  ;;  %v602_v58 = vcvt.s32.f32 %v595_v47  ;;  %vm724_vm13 = vcmp.eq.s32.totalorder %v719_v43, 2 }
 0x190   : > { %v488_v60 = vsel %vm1072_vm15, 0, %v1071_v45  ;;  %vm721_vm15 = vcmp.eq.s32.totalorder %v719_v43, 0 }
 0x191   : > { %v600_v56 = vand.u32 2147483647, %v599_v52  ;;  %v489_v38 = vsub.s32 32, %v488_v60  ;;  %v493_v62 = vsub.s32 4294967266, %v488_v60  ;;  %v490_v51 = vshll.u32 %v481_v32, %v488_v60 }
 0x192   : > { %v1239_v53 = vpop.eup %1238 }
 0x193   : > { %v603_v49 = vmul.f32 %v602_v58, %v600_v56  ;;  %v491_v3 = vshrl.u32 %v473_v37, %v489_v38  ;;  %v494_v59 = vadd.s32 127, %v493_v62  ;;  %v416_v24 = vadd.f32 0.5, %v1239_v53 }
 0x195   : > { %v604_v54 = vxor.u32 2147483648, %v603_v49  ;;  %v492_v61 = vor.u32 %v491_v3, %v490_v51  ;;  %v495_v63 = vshll.u32 %v494_v59, 23  ;;  %v835_v3 = vld [vmem:[#allocation6] sm:$0xff]  ;;  %v837_v59 = vld [vmem:[#allocation6 + $0x10] sm:$0xf] }
 0x197   : > { %v605_v0 = vsel %vm522_vm0, %v604_v54, %v603_v49  ;;  %v496_v5 = vor.u32 4788187, %v495_v63  ;;  %v499_v8 = vcvt.s32.f32 %v492_v61  ;;  %vm511_vm0 = vcmp.lt.s32.totalorder %v510_v41, 2  ;;  %v844_v54 = vpop.permute.xlu1 %843 }
 0x198   : > { %v608_v2 = vsel %vm521_vm2, %v1592_v29, %v605_v0  ;;  %vm720_vm2 = vcmp.lt.s32.totalorder %v719_v43, 2 }
 0x199   : > { %1240 = vcosq.f32 %v608_v2  ;;  %v497_v7 = vand.u32 2147483647, %v496_v5 }
 0x19a   : > { %1242 = vsinq.f32 %v608_v2 }
 0x19b   : > { %v500_v10 = vmul.f32 %v499_v8, %v497_v7  ;;  %1244 = vrcp.f32 %v409_v14  ;;  %v849_v61 = vpop.permute.xlu1 %848 }
 0x19d   : > { %v501_v16 = vxor.u32 2147483648, %v500_v10 }
 0x19f   : > { %v502_v31 = vsel %vm419_vm3, %v501_v16, %v500_v10  ;;  %vm509_vm3 = vweird.f32 %v1594_v30 }
 0x1a0   : > { %v505_v17 = vsel %vm418_vm4, %v1594_v30, %v502_v31  ;;  %vm856_vm4 = vcmask 261120   ;;  %v836_v30 = vld [vmem:[#allocation6 + $0x8] sm:$0xff] }
 0x1a1   : > { %1246 = vcosq.f32 %v505_v17 }
 0x1a2   : > { %1248 = vsinq.f32 %v505_v17 }
 0x1a3   : > { %v1241_v21 = vpop.eup %1240 }
 0x1a4   : > { %v1243_v23 = vpop.eup %1242  ;;  %v619_v26 = vxor.u32 2147483648, %v1241_v21 }
 0x1a5   : > { %v616_v27 = vxor.u32 2147483648, %v1243_v23  ;;  %v1245_v4 = vpop.eup %1244 }
 0x1a6   : > { %v620_v36 = vsel %vm618_vm6, %v619_v26, %v1243_v23  ;;  %v830_v25 = vsel %vm828_vm7, %v619_v26, %v1243_v23  ;;  %v415_v45 = vadd.f32 0.5, %v1245_v4 }
 0x1a7   : > { %v617_v32 = vsel %vm615_vm5, %v1241_v21, %v616_v27  ;;  %v827_v33 = vsel %vm825_vm8, %v1241_v21, %v616_v27 }
 0x1a8   : > { %v621_v34 = vsel %vm614_vm9, %v617_v32, %v620_v36  ;;  %v831_v35 = vsel %vm824_vm10, %v827_v33, %v830_v25 }
 0x1a9   : > { %v622_v39 = vsel %vm612_vm11, nan, %v621_v34  ;;  %v832_v40 = vsel %vm612_vm11, nan, %v831_v35 }
 0x1aa   : > { %v624_v42 = vmul.f32 %v622_v39, %v416_v24  ;;  %v834_v44 = vmul.f32 %v832_v40, %v416_v24 }
 0x1ab   : > { %v1247_v46 = vpop.eup %1246 }
 0x1ac   : > { %v1249_v47 = vpop.eup %1248  ;;  %v516_v50 = vxor.u32 2147483648, %v1247_v46 }
 0x1ad   : > { %v513_v52 = vxor.u32 2147483648, %v1249_v47 }
 0x1ae   : > { %v517_v55 = vsel %vm515_vm12, %v516_v50, %v1249_v47  ;;  %v726_v29 = vsel %vm724_vm13, %v516_v50, %v1249_v47 }
 0x1af   : > { %v514_v56 = vsel %vm512_vm14, %v1247_v46, %v513_v52  ;;  %v723_v58 = vsel %vm721_vm15, %v1247_v46, %v513_v52 }
 0x1b0   : > { %v518_v60 = vsel %vm511_vm0, %v514_v56, %v517_v55  ;;  %v727_v37 = vsel %vm720_vm2, %v723_v58, %v726_v29 }
 0x1b1   : > { %v519_v38 = vsel %vm509_vm3, nan, %v518_v60  ;;  %v728_v62 = vsel %vm509_vm3, nan, %v727_v37 }
 0x1b2   : > { %v623_v57 = vmul.f32 %v519_v38, %v415_v45  ;;  %v833_v49 = vmul.f32 %v728_v62, %v415_v45 }
 0x1b4   : > { %v1131_v48 = vpack.c.bf16 %v624_v42, %v623_v57  ;;  %v1134_v51 = vpack.c.bf16 %v834_v44, %v833_v49 }
 0x1b6   : > { %1132 = vmatpush3.bf16.msra.mxu0 %v1131_v48  ;;  %1138 = vmatpush3.bf16.msra.mxu1 %v1131_v48 }
 0x1b7   : > { %1133 = vmatprep.subr.bf16.mxu0 %v1383_v11  ;;  %1137 = vmatprep.subr.bf16.mxu1 %v1383_v11 }
 0x1ba   : > { %1135 = vmatpush3.bf16.msra.mxu0 %v1134_v51  ;;  %1139 = vmatpush3.bf16.msra.mxu1 %v1134_v51 }
 0x1bd   : > { %1118 = vmatmul.mubr.msk.f32.vlgmr.msra.gmra.mrb[2].mxu0 %vm856_vm4, %v835_v3  ;;  %1121 = vmatmul.mubr.msk.f32.vlgmr.msra.gmra.mrb[0].mxu1 %vm856_vm4, %v836_v30 }
 0x1be   : > { %1123 = vmatprep.mubr.msk.f32.mxu1 %vm1384_vm1, %v1385_v19  ;;  %v854_v19 = vpop.permute.xlu0 %853 }
 0x1c1   : > { %1124 = vmatmul.mubr.msk.f32.gmra.mrb[2].mxu1 %vm856_vm4, %v837_v59 }
 0x290   : > { %v932_v63 = vpop.f32.mrb[2].mxu0  ;;  %v937_v11 = vpop.f32.mrb[0].mxu1 }
 0x291   : > { %v933_v0 = vadd.f32 %v932_v63, %v844_v54  ;;  %v938_v1 = vadd.f32 %v937_v11, %v849_v61  ;;  %v1122_v2 = vpop.f32.mrb[1].mxu1  ;;  %v1119_v5 = vpop.f32.mrb[3].mxu0 }
 0x293   : > { %946 = vst [vmem:[%s290_s17] sm:$0xff] %v933_v0  ;;  %947 = vst [vmem:[%s290_s17 + $0x8] sm:$0xff] %v938_v1 }
 0x294   : > { %v942_v6 = vpop.f32.mrb[2].mxu1 }
 0x295   : > { %v943_v7 = vadd.f32 %v942_v6, %v854_v19  ;;  %v1125_v8 = vpop.f32.mrb[3].mxu1 }
 0x297   : > { %948 = vst [vmem:[%s290_s17 + $0x10] sm:$0xf] %v943_v7 }
 0x298   : > { %1319 = shalt.err (!%p1316_p2)
}
 0x299   : > { %s1320_s13 = scalar_lea.hbm %s1670_s23, 384  ;;  %s1324_s16 = scalar_lea.hbm %s1719_s5, 768 }
 0x29a   : > { %p1321_p0 = scmp.ne.s32.totalorder %s1670_s23, %s1320_s13  ;;  %p1325_p10 = scmp.lt.u32.totalorder %s1670_s23, %s1719_s5 }
 0x29b   : > { %p1326_p11 = scmp.lt.u32.totalorder %s1324_s16, %s1320_s13  ;;  %p1328_p4 = scmp.lt.u32.totalorder %s1320_s13, %s1670_s23 }
 0x29c   : > { %p1322_p5 = pnand %p1321_p0, %p1734_p3 }
 0x29d   : > { %p1327_p12 = por %p1326_p11, %p1325_p10 }
 0x29e   : > { %p1323_p6 = pneg %p1322_p5 }
 0x29f   : > { %p1329_p7 = por %p1328_p4, %p1327_p12 }
 0x2a1   : > { %p1330_p8 = pnand %p1329_p7, %p1323_p6 }
 0x2a3   : > { %1333 = shalt.err (!%p1330_p8)
}
 0x2a4   : > { %s1393_s26 = smov 128   ;;  %s1394_s7 = smov 256  }
 0x2a5   : > { %s1395_s6 = smov 8  }
 0x2a6   : > { %1157 = dma.vmem_to_hbm [thread:$0]  (%p1734_p3), %s1665_s11, 384, %s1670_s23, %s950_s25, %s1393_s26, %s1394_s7, %s1395_s6  }
 0x2a7 PF: > { %s977_s8 = sand.u32 1, %s1364_s18   ;;  %p1735_p9 = scmp.ne.s32.totalorder %s1725_s30, 0 }
 0x2a8   : > { %s978_s22 = scalar_lea.sflag [#allocation5], %s977_s8 }
 0x2a9   : > { %p1167_p13 = pnand %p1056_p1, %p1735_p9 }
 0x2ab   : > { %1359 = dma.done.wait (!%p1167_p13), %s978_s22, 384  }
 0x2ac   : > { %1361 = vsyncadd (!%p1167_p13), %s978_s22, 4294966912  ;;  %p17_p2 = scmp.ge.s32.totalorder %s1451_s24, 4   ;;  %s1736_s18 = smov %s1368_s19 }
 0x2ad   : > { %s1737_s19 = smov %s1372_s20  ;;  %s1738_s20 = smov %s1463_s27 }
 0x2ae   : > { %s1739_s21 = smov %s1451_s24  ;;  %19 = sbr.rel (!%p17_p2) target bundleno = 5 (0x5), region = 127 }
 0x2b5   :  { %983 = vsyncpa [#allocation4], 1 }
 0x2b6   :  { %985 = vsyncpa [#allocation4 + $0x1], 1 }
 0x2b7   :  { %986 = vsyncpa [#allocation7], 1 }
 0x2b8   :  { %987 = vsyncpa [#allocation5], 1 }
 0x2b9   :  { %989 = vsyncpa [#allocation5 + $0x1], 1 }

</bundles_post_ra>
